<compile_context>
chip_gen: v7x
topology: tpu7x:2x2x1
jax: 0.10.0
libtpu: 0.0.40
codegen_flags: <defaults>
</compile_context>

<pallas_src>
import functools

import jax
import jax.numpy as jnp
from jax.experimental import pallas as pl
from jax.experimental.pallas import tpu as pltpu

LANES = 128
SUBLANES = 8
ALIGN = SUBLANES * LANES          # 1024 elements per (8, 128) vreg
CHUNK_ROWS = 1024                 # in-kernel accumulation chunk (512 KiB f32)


def _device_kind():
    try:
        return jax.devices()[0].device_kind.lower()
    except Exception:
        return ""


def _mape_partial_kernel(inpt_ref, tgt_ref, out_ref, *, tile_rows, chunk_rows,
                         num_tiles, tiles_per_split, last_tile_rows,
                         needs_clamp):
    """Accumulate sum(|divide_no_nan(tgt - inpt, tgt)|) of one tile into the
    resident (1, 8, 128) partial-sum output block."""
    j = pl.program_id(1)

    @pl.when(j == 0)
    def _init():
        out_ref[...] = jnp.zeros_like(out_ref)

    def add_rows(start, nrows):
        # nrows is a static multiple of SUBLANES; start is 8-aligned.
        tgt = tgt_ref[pl.ds(start, nrows), :].astype(jnp.float32)
        inp = inpt_ref[pl.ds(start, nrows), :].astype(jnp.float32)
        a = jnp.abs((tgt - inp) / tgt)
        # divide_no_nan: NaN / +-Inf division results -> 0.  abs(NaN) < inf and
        # abs(+-Inf) < inf are both False, so one compare covers every case.
        # (EUP approx-reciprocal micro-opt deliberately skipped: rtol risk.)
        contrib = jnp.where(a < jnp.inf, a, jnp.float32(0.0))
        # Cheap VPU fold down to one (8, 128) vreg of partial sums; the single
        # cross-lane reduction happens once, in the wrapper.
        partial = contrib.reshape(nrows // SUBLANES, SUBLANES, LANES).sum(axis=0)
        out_ref[...] += partial[None]

    def accumulate(valid_rows):
        # Chunked so in-kernel temporaries stay ~chunk-sized regardless of how
        # large the DMA tile is (keeps VMEM/vreg pressure flat).
        nchunks = valid_rows // chunk_rows
        rem = valid_rows - nchunks * chunk_rows
        if nchunks == 1:
            add_rows(0, chunk_rows)
        elif nchunks > 1:
            @pl.loop(0, nchunks)
            def _(c):
                add_rows(pl.multiple_of(c * chunk_rows, chunk_rows), chunk_rows)
        if rem:
            add_rows(nchunks * chunk_rows, rem)

    has_partial = last_tile_rows != tile_rows
    if not has_partial and not needs_clamp:
        accumulate(tile_rows)                 # hot path: no masks, no branches
    else:
        t = pl.program_id(0) * tiles_per_split + j
        full_cond = (t < num_tiles - 1) if has_partial else (t < num_tiles)

        @pl.when(full_cond)
        def _full():
            accumulate(tile_rows)

        if has_partial:
            @pl.when(t == num_tiles - 1)
            def _last():
                accumulate(last_tile_rows)
        # Phantom tiles (t >= num_tiles, only when needs_clamp) fall through
        # both branches and contribute nothing (no double counting).


def mape_loss(inpt, tgt, *, max_tile_rows=None):
    """Pallas implementation of MapeLoss.forward(inpt, tgt) -> scalar."""
    assert inpt.shape == tgt.shape
    n = int(inpt.size)
    if n == 0:
        return jnp.float32(jnp.nan)

    flat_i = jnp.ravel(inpt)
    flat_t = jnp.ravel(tgt)

    main = (n // ALIGN) * ALIGN

    # Ragged tail (< 1024 elements): plain jnp in the wrapper, so the kernel
    # only ever sees statically 8x128-aligned row ranges and needs no masks.
    if main < n:
        ti = flat_i[main:].astype(jnp.float32)
        tt = flat_t[main:].astype(jnp.float32)
        a = jnp.abs((tt - ti) / tt)
        tail_sum = jnp.sum(jnp.where(a < jnp.inf, a, jnp.float32(0.0)))
    else:
        tail_sum = jnp.float32(0.0)

    if main == 0:          # tiny input: no kernel needed
        return tail_sum / n

    if main < n:
        # TODO(synk): this prefix slice still materializes one copy of the
        # aligned prefix; a memory_space=pl.ANY + bounded manual-DMA path would
        # make the ragged case fully zero-copy.
        flat_i = flat_i[:main]
        flat_t = flat_t[:main]

    rows = main // LANES                     # multiple of SUBLANES
    slab_i = flat_i.reshape(rows, LANES)     # free reshape, no copy
    slab_t = flat_t.reshape(rows, LANES)

    kind = _device_kind()
    is_v5e = ("v5 lite" in kind) or ("v5e" in kind) or ("v5lite" in kind)
    two_cores = "v7" in kind                 # v7x: 2 TensorCores per chip

    if max_tile_rows is None:
        # 4 MiB f32 per input block on v6e/v7x, 2 MiB on v5e (16 MiB scoped
        # VMEM default there).
        max_tile_rows = 4096 if is_v5e else 8192
    assert max_tile_rows % SUBLANES == 0

    tile_rows = min(max_tile_rows, rows)     # multiple of 8
    chunk_rows = min(CHUNK_ROWS, tile_rows)  # multiple of 8
    num_tiles = pl.cdiv(rows, tile_rows)
    last_tile_rows = rows - (num_tiles - 1) * tile_rows   # multiple of 8

    nsplit = 2 if (two_cores and num_tiles >= 2) else 1
    tiles_per_split = pl.cdiv(num_tiles, nsplit)
    needs_clamp = nsplit * tiles_per_split != num_tiles

    def in_index_map(s, j):
        t = s * tiles_per_split + j
        if needs_clamp:  # phantom tiles re-read the last real tile (skipped in-kernel)
            t = jnp.minimum(t, num_tiles - 1)
        return (t, 0)

    kernel = functools.partial(
        _mape_partial_kernel,
        tile_rows=tile_rows,
        chunk_rows=chunk_rows,
        num_tiles=num_tiles,
        tiles_per_split=tiles_per_split,
        last_tile_rows=last_tile_rows,
        needs_clamp=needs_clamp,
    )

    if nsplit == 2:
        # Actually shard the split across v7x's two TensorCores.
        dims = (pltpu.CORE_PARALLEL, pltpu.ARBITRARY)
    else:
        dims = (pltpu.ARBITRARY, pltpu.ARBITRARY)

    itemsize = max(jnp.dtype(inpt.dtype).itemsize, jnp.dtype(tgt.dtype).itemsize)
    io_bytes = 2 * 2 * tile_rows * LANES * itemsize       # 2 inputs, double-buffered
    vmem_limit = max(16 << 20, min(2 * io_bytes + (8 << 20), 100 << 20))

    partials = pl.pallas_call(
        kernel,
        out_shape=jax.ShapeDtypeStruct((nsplit, SUBLANES, LANES), jnp.float32),
        grid_spec=pltpu.PrefetchScalarGridSpec(
            num_scalar_prefetch=0,
            grid=(nsplit, tiles_per_split),
            in_specs=[
                pl.BlockSpec((tile_rows, LANES), in_index_map),
                pl.BlockSpec((tile_rows, LANES), in_index_map),
            ],
            out_specs=pl.BlockSpec((1, SUBLANES, LANES), lambda s, j: (s, 0, 0)),
        ),
        compiler_params=pltpu.CompilerParams(
            dimension_semantics=dims,
            vmem_limit_bytes=int(vmem_limit),
        ),
    )(slab_i, slab_t)

    # Tiny final cross-lane reduction + mean in the wrapper.
    return (jnp.sum(partials) + tail_sum) / n


def _reference(inpt, tgt):
    ratio = (tgt - inpt) / tgt
    bad = jnp.isnan(ratio) | jnp.isinf(ratio)
    ratio = jnp.where(bad, 0.0, ratio)
    return jnp.mean(jnp.abs(ratio))


if __name__ == "__main__":
    key = jax.random.PRNGKey(0)

    def run_case(shape, k, **kwargs):
        k1, k2 = jax.random.split(k)
        inpt = jax.random.normal(k1, shape, dtype=jnp.float32)
        tgt = jax.random.normal(k2, shape, dtype=jnp.float32)
        # Exercise the divide-no-nan path: x/0 -> Inf and 0/0 -> NaN.
        tgt = tgt.reshape(-1).at[:4].set(0.0).reshape(shape)
        inpt = inpt.reshape(-1).at[0].set(0.0).reshape(shape)
        out = mape_loss(inpt, tgt, **kwargs)
        jax.block_until_ready(out)
        ref = _reference(inpt, tgt)
        assert jnp.allclose(out, ref, rtol=1e-4, atol=1e-6), (shape, out, ref)

    keys = jax.random.split(key, 4)
    run_case((2, 4, 16, 16), keys[0])                        # aligned numel, single tile
    run_case((3, 5, 7, 11), keys[1])                         # ragged numel -> wrapper tail path
    run_case((4, 8, 96, 128), keys[2])                       # larger tile, chunked inner loop
    run_case((4, 8, 96, 128), keys[3], max_tile_rows=1280)   # multi-tile + partial last tile
    print("KERNEL_OK")
</pallas_src>

<mosaic_0001>
module attributes {stable_mosaic.version = 11 : i64} {
  func.func @_mape_partial_kernel(%arg0: i32, %arg1: i32, %arg2: memref<16x128xf32, #tpu.memory_space<vmem>>, %arg3: memref<16x128xf32, #tpu.memory_space<vmem>>, %arg4: memref<1x8x128xf32, #tpu.memory_space<vmem>>) attributes {dimension_semantics = [#tpu.dimension_semantics<arbitrary>, #tpu.dimension_semantics<arbitrary>], iteration_bounds = array<i64: 1, 1>, scalar_prefetch = 0 : i64, scratch_operands = 0 : i64, tpu.core_type = #tpu.core_type<tc>, window_params = [{transform_indices = @transform_0, window_bounds = array<i64: 16, 128>}, {transform_indices = @transform_1, window_bounds = array<i64: 16, 128>}, {transform_indices = @transform_2, window_bounds = array<i64: 1, 8, 128>}]} {
    %c0_i32 = arith.constant 0 : i32
    %0 = arith.cmpi eq, %arg1, %c0_i32 : i32
    %1 = arith.extui %0 : i1 to i32
    %c0_i32_0 = arith.constant 0 : i32
    %2 = arith.cmpi ne, %1, %c0_i32_0 : i32
    scf.if %2 {
      %cst_12 = arith.constant 0.000000e+00 : f32
      %18 = vector.broadcast %cst_12 : f32 to vector<1x8x128xf32>
      %c0_13 = arith.constant 0 : index
      %c0_14 = arith.constant 0 : index
      %c0_15 = arith.constant 0 : index
      %19 = vector.load %arg4[%c0_13, %c0_14, %c0_15] : memref<1x8x128xf32, #tpu.memory_space<vmem>>, vector<1x8x128xf32>
      tpu.vector_store %arg4[%c0_13, %c0_14, %c0_15], %18 {strides = array<i32>} : memref<1x8x128xf32, #tpu.memory_space<vmem>>, vector<1x8x128xf32>,
    } else {
    }
    %c0 = arith.constant 0 : index
    %c0_1 = arith.constant 0 : index
    %3 = vector.load %arg3[%c0, %c0_1] : memref<16x128xf32, #tpu.memory_space<vmem>>, vector<16x128xf32>
    %c0_2 = arith.constant 0 : index
    %c0_3 = arith.constant 0 : index
    %4 = vector.load %arg2[%c0_2, %c0_3] : memref<16x128xf32, #tpu.memory_space<vmem>>, vector<16x128xf32>
    %5 = arith.subf %3, %4 : vector<16x128xf32>
    %6 = arith.divf %5, %3 : vector<16x128xf32>
    %7 = math.absf %6 : vector<16x128xf32>
    %cst = arith.constant 0x7F800000 : f32
    %8 = vector.broadcast %cst : f32 to vector<16x128xf32>
    %9 = arith.cmpf olt, %7, %8 : vector<16x128xf32>
    %cst_4 = arith.constant 0.000000e+00 : f32
    %10 = vector.broadcast %cst_4 : f32 to vector<16x128xf32>
    %11 = arith.select %9, %7, %10 : vector<16x128xi1>, vector<16x128xf32>
    %12 = vector.shape_cast %11 : vector<16x128xf32> to vector<2x8x128xf32>
    %cst_5 = arith.constant dense<0.000000e+00> : vector<8x128xf32>
    %13 = vector.multi_reduction <add>, %12, %cst_5 [0] : vector<2x8x128xf32> to vector<8x128xf32>
    %c0_6 = arith.constant 0 : index
    %c0_7 = arith.constant 0 : index
    %c0_8 = arith.constant 0 : index
    %14 = vector.load %arg4[%c0_6, %c0_7, %c0_8] : memref<1x8x128xf32, #tpu.memory_space<vmem>>, vector<1x8x128xf32>
    %15 = vector.shape_cast %13 : vector<8x128xf32> to vector<1x8x128xf32>
    %16 = arith.addf %14, %15 : vector<1x8x128xf32>
    %c0_9 = arith.constant 0 : index
    %c0_10 = arith.constant 0 : index
    %c0_11 = arith.constant 0 : index
    %17 = vector.load %arg4[%c0_9, %c0_10, %c0_11] : memref<1x8x128xf32, #tpu.memory_space<vmem>>, vector<1x8x128xf32>
    tpu.vector_store %arg4[%c0_9, %c0_10, %c0_11], %16 {strides = array<i32>} : memref<1x8x128xf32, #tpu.memory_space<vmem>>, vector<1x8x128xf32>,
    return
  }
  func.func @transform_0(%arg0: i32, %arg1: i32) -> (i32, i32) {
    %c1_i32 = arith.constant 1 : i32
    %0 = arith.muli %arg0, %c1_i32 : i32
    %1 = arith.addi %0, %arg1 : i32
    %c0_i32 = arith.constant 0 : i32
    %c0_i32_0 = arith.constant 0 : i32
    return %1, %c0_i32 : i32, i32
  }
  func.func @transform_1(%arg0: i32, %arg1: i32) -> (i32, i32) {
    %c1_i32 = arith.constant 1 : i32
    %0 = arith.muli %arg0, %c1_i32 : i32
    %1 = arith.addi %0, %arg1 : i32
    %c0_i32 = arith.constant 0 : i32
    %c0_i32_0 = arith.constant 0 : i32
    return %1, %c0_i32 : i32, i32
  }
  func.func @transform_2(%arg0: i32, %arg1: i32) -> (i32, i32, i32) {
    %c0_i32 = arith.constant 0 : i32
    %c0_i32_0 = arith.constant 0 : i32
    %c0_i32_1 = arith.constant 0 : i32
    return %arg0, %c0_i32, %c0_i32_0 : i32, i32, i32
  }
}

</mosaic_0001>

<bundles_post_ra>
// kernel: tpu_custom_call.1
= control target key start
LH: loop header
LB: loop body
LE: loop exit
PB: predicated region body
PF: predicated region fallthrough
CT: control target
= control target key end

     0   :  { %7 = vsyncpa [#allocation3], 0  ;;  %s231_s0 = inlined_call_operand.hbm [shape: f32[16,128], index: 0, kind: input, shape index: {}]   ;;  %s232_s1 = inlined_call_operand.hbm [shape: f32[16,128], index: 1, kind: input, shape index: {}]   ;;  %s233_s2 = inlined_call_operand.hbm [shape: f32[1,8,128], index: 2, kind: output, shape index: {}]  }
   0x1   :  { %8 = vsyncpa [#allocation6], 0 }
   0x2   :  { %9 = vsyncpa [#allocation4], 0  ;;  %s175_s9 = smov [#allocation2]   ;;  %s103_s13 = scalar_lea.hbm %s231_s0, 256 }
   0x3   :  { %s19_s10 = sshll.u32 %s175_s9, 4  ;;  %p104_p0 = scmp.ne.s32.totalorder %s231_s0, %s103_s13  ;;  %s20_s10 = int_to_ptr.vmem [resolvable:$true] %s19_s10 }
   0x4   :  { %p107_p1 = scmp.lt.u32.totalorder %s103_s13, %s231_s0 }
   0x6   :  { %p109_p2 = pnand %p107_p1, %p104_p0 }
   0x8   :  { %112 = shalt.err (!%p109_p2)
}
   0x9   :  { %s113_s18 = scalar_lea.vmem %s20_s10, 256  ;;  %p118_p4 = scmp.lt.s32.totalorder %s20_s10, %s20_s10 }
   0xa   :  { %p114_p3 = scmp.ne.s32.totalorder %s20_s10, %s113_s18  ;;  %p119_p5 = scmp.lt.s32.totalorder %s113_s18, %s113_s18 }
   0xc   :  { %p120_p6 = por %p119_p5, %p118_p4 }
   0xe   :  { %p121_p7 = pnand %p120_p6, %p114_p3 }
  0x10   :  { %124 = shalt.err (!%p121_p7)
}
  0x11   :  { %s176_s19 = smov 128   ;;  %s177_s20 = smov 8  }
  0x12   :  { %25 = dma.hbm_to_vmem [thread:$0]  %s231_s0, 256, %s20_s10, [#allocation3], %s176_s19, %s176_s19, %s177_s20  }
  0x13   :  { %s178_s23 = smov [#allocation5]   ;;  %s125_s27 = scalar_lea.hbm %s232_s1, 256 }
  0x14   :  { %s35_s24 = sshll.u32 %s178_s23, 4  ;;  %p126_p8 = scmp.ne.s32.totalorder %s232_s1, %s125_s27  ;;  %s36_s24 = int_to_ptr.vmem [resolvable:$true] %s35_s24 }
  0x15   :  { %p129_p9 = scmp.lt.u32.totalorder %s125_s27, %s232_s1 }
  0x17   :  { %p131_p10 = pnand %p129_p9, %p126_p8 }
  0x19   :  { %134 = shalt.err (!%p131_p10)
}
  0x1a   :  { %s135_s4 = scalar_lea.vmem %s36_s24, 256  ;;  %p140_p12 = scmp.lt.s32.totalorder %s36_s24, %s36_s24 }
  0x1b   :  { %p136_p11 = scmp.ne.s32.totalorder %s36_s24, %s135_s4  ;;  %p141_p13 = scmp.lt.s32.totalorder %s135_s4, %s135_s4 }
  0x1d   :  { %p142_p0 = por %p141_p13, %p140_p12 }
  0x1f   :  { %p143_p1 = pnand %p142_p0, %p136_p11 }
  0x21   :  { %146 = shalt.err (!%p143_p1)
}
  0x22   :  { %41 = dma.hbm_to_vmem [thread:$0]  %s232_s1, 256, %s36_s24, [#allocation6], %s176_s19, %s176_s19, %s177_s20  }
  0x23   :  { %169 = dma.done.wait [#allocation3], 256  }
  0x24   :  { %170 = vsyncadd [#allocation3], 4294967040 }
  0x25   :  { %171 = dma.done.wait [#allocation6], 256  }
  0x26   :  { %172 = vsyncadd [#allocation6], 4294967040  ;;  %v57_v0 = vld [vmem:[#allocation5] sm:$0xff]  ;;  %v58_v1 = vld [vmem:[#allocation5 + $0x8] sm:$0xff]  ;;  %s179_s1 = smov [#allocation7]  }
  0x27   :  { %99 = vrcp.f32 %v57_v0  ;;  %v59_v2 = vld [vmem:[#allocation2] sm:$0xff]  ;;  %v60_v3 = vld [vmem:[#allocation2 + $0x8] sm:$0xff]  ;;  %s83_s6 = sshll.u32 %s179_s1, 4  ;;  %s84_s6 = int_to_ptr.vmem [resolvable:$true] %s83_s6 }
  0x28   :  { %101 = vrcp.f32 %v58_v1  ;;  %v61_v4 = vsub.f32 %v57_v0, %v59_v2  ;;  %v62_v5 = vsub.f32 %v58_v1, %v60_v3  ;;  %s147_s7 = scalar_lea.vmem %s84_s6, 128  ;;  %p152_p3 = scmp.lt.s32.totalorder %s84_s6, %s84_s6 }
  0x29   :  { %p148_p2 = scmp.ne.s32.totalorder %s84_s6, %s147_s7  ;;  %p153_p4 = scmp.lt.s32.totalorder %s147_s7, %s147_s7 }
  0x2b   :  { %p154_p5 = por %p153_p4, %p152_p3 }
  0x2d   :  { %p155_p6 = pnand %p154_p5, %p148_p2 }
  0x31   :  { %v100_v6 = vpop.eup %99 }
  0x32   :  { %v102_v7 = vpop.eup %101  ;;  %v64_v8 = vmul.f32 %v100_v6, %v61_v4 }
  0x33   :  { %v66_v9 = vmul.f32 %v102_v7, %v62_v5 }
  0x34   :  { %v67_v10 = vand.u32 2147483647, %v64_v8 }
  0x35   :  { %v68_v11 = vand.u32 2147483647, %v66_v9 }
  0x36   :  { %vm69_vm0 = vcmp.lt.f32.partialorder %v67_v10, inf }
  0x37   :  { %vm70_vm1 = vcmp.lt.f32.partialorder %v68_v11, inf  ;;  %v71_v12 = vsel %vm69_vm0, %v67_v10, 0.0 }
  0x38   :  { %v72_v13 = vsel %vm70_vm1, %v68_v11, 0.0 }
  0x39   :  { %v73_v14 = vadd.f32 %v72_v13, %v71_v12 }
  0x3b   :  { %76 = vst [vmem:[#allocation7] sm:$0xff] %v73_v14 }
  0x3c   :  { %158 = shalt.err (!%p155_p6)
}
  0x3d   :  { %s159_s10 = scalar_lea.hbm %s233_s2, 128 }
  0x3e   :  { %p160_p7 = scmp.ne.s32.totalorder %s233_s2, %s159_s10  ;;  %p163_p8 = scmp.lt.u32.totalorder %s159_s10, %s233_s2 }
  0x40   :  { %p165_p9 = pnand %p163_p8, %p160_p7 }
  0x42   :  { %168 = shalt.err (!%p165_p9)
}
  0x43   :  { %86 = dma.vmem_to_hbm [thread:$0]  %s84_s6, 128, %s233_s2, [#allocation4]  }
  0x44   :  { %173 = dma.done.wait [#allocation4], 128  }
  0x45   :  { %174 = vsyncadd [#allocation4], 4294967168 }
  0x46   :  { %90 = vsyncpa [#allocation3], 1 }
  0x47   :  { %91 = vsyncpa [#allocation6], 1 }
  0x48   :  { %92 = vsyncpa [#allocation4], 1 }

</bundles_post_ra>
